<compile_context>
chip_gen: v6e
topology: v6e:2x2x1
jax: 0.10.0
libtpu: 0.0.40
codegen_flags: <defaults>
</compile_context>

<pallas_src>
import functools

import jax
import jax.numpy as jnp
from jax.experimental import pallas as pl
from jax.experimental.pallas import tpu as pltpu

LANE = 128      # vreg lane width (last dim)
SUBLANE = 8     # vreg sublane width (second-to-last dim)


def _round_up(n, m):
    return (n + m - 1) // m * m


# ----------------------------------------------------------------------------
# Fused kernel: one batch-tile of x -> [Linear (+ Swish)] * n_layers -> out,
# entirely in VMEM / vregs.
# refs = (x_ref, w0, b0, w1, b1, ..., w_{n-1}, b_{n-1}, o_ref)
# ----------------------------------------------------------------------------
def _make_fused_mlp_kernel(n_layers):
    def kernel(*refs):
        x_ref = refs[0]
        o_ref = refs[-1]
        y = x_ref[...].astype(jnp.float32)
        for i in range(n_layers):
            w_ref = refs[1 + 2 * i]
            b_ref = refs[2 + 2 * i]
            # MXU matmul with f32 accumulation + bias broadcast over batch.
            y = jnp.dot(y, w_ref[...], preferred_element_type=jnp.float32)
            y = y + b_ref[...]
            if i != n_layers - 1:
                # Swish: y * sigmoid(y). exp/logistic runs on the EUP slot.
                y = y * jax.nn.sigmoid(y)
        o_ref[...] = y.astype(o_ref.dtype)

    return kernel


# ----------------------------------------------------------------------------
# One-time parameter preparation: transpose to (in, out) and zero-pad the
# *hidden* feature dims to lane-dense 128-multiples.  The network input dim
# (first layer K) and the network output dim (last layer N) keep their true
# sizes so x needs no padding and the output needs no slicing.
# ----------------------------------------------------------------------------
def prepare_params(params):
    n = len(params)
    prepared = []
    for i, (w, b) in enumerate(params):      # w: (out, in)  [PyTorch layout], b: (out,)
        out_f, in_f = w.shape
        in_p = in_f if i == 0 else _round_up(in_f, LANE)
        out_p = out_f if i == n - 1 else _round_up(out_f, LANE)
        w_t = jnp.zeros((in_p, out_p), jnp.float32).at[:in_f, :out_f].set(w.T)
        b_p = jnp.zeros((1, out_p), jnp.float32).at[0, :out_f].set(b)
        prepared.append((w_t, b_p))
    return prepared


def fused_mlp_pallas(x, prepared, *, max_batch_tile=512):
    """Single fused pallas_call for the whole MLP, tiled over the batch dim."""
    batch, in_f = x.shape
    n_layers = len(prepared)
    out_f = prepared[-1][0].shape[1]

    # Batch tiling: one full-batch block for small batches (block == full dim
    # is always legal), otherwise 512-row tiles (multiple of 8) on a 1-D grid.
    if batch <= max_batch_tile:
        tile_b = batch
    else:
        tile_b = max_batch_tile
    grid = (pl.cdiv(batch, tile_b),)

    flat_params = []
    in_specs = [pl.BlockSpec((tile_b, in_f), lambda i: (i, 0))]
    for w_t, b_p in prepared:
        flat_params.extend([w_t, b_p])
        # Constant index_map -> weights/biases DMA'd once, VMEM-resident
        # across all batch-grid steps.
        in_specs.append(pl.BlockSpec(w_t.shape, lambda i: (0, 0)))
        in_specs.append(pl.BlockSpec(b_p.shape, lambda i: (0, 0)))
    out_spec = pl.BlockSpec((tile_b, out_f), lambda i: (i, 0))

    # VMEM budget derived from actual tile/param sizes (v7x has 64 MiB/TC).
    param_bytes = sum(w.size * w.dtype.itemsize + b.size * b.dtype.itemsize
                      for w, b in prepared)
    widths = [in_f] + [w.shape[1] for w, _ in prepared]
    act_bytes = tile_b * max(widths) * 4 * (n_layers + 1)
    io_bytes = 2 * tile_b * (in_f + out_f) * 4          # double-buffered x/out tiles
    est = 2 * param_bytes + act_bytes + io_bytes
    vmem_limit = int(min(max(4 * est, 8 * 1024 * 1024), 48 * 1024 * 1024))

    return pl.pallas_call(
        _make_fused_mlp_kernel(n_layers),
        out_shape=jax.ShapeDtypeStruct((batch, out_f), x.dtype),
        grid=grid,
        in_specs=in_specs,
        out_specs=out_spec,
        compiler_params=pltpu.CompilerParams(
            dimension_semantics=("parallel",),      # shards batch grid over 2 TCs on v7x
            vmem_limit_bytes=vmem_limit,
        ),
    )(x, *flat_params)


@functools.partial(jax.jit, static_argnames=("max_batch_tile",))
def module_forward(x, prepared, max_batch_tile=512):
    """Equivalent of Module.forward: one fused Pallas kernel, no wrapper ops."""
    return fused_mlp_pallas(x, prepared, max_batch_tile=max_batch_tile)


# ----------------------------------------------------------------------------
# Parameter init mimicking torch.nn.Linear's U(-1/sqrt(fan_in), 1/sqrt(fan_in)).
# ----------------------------------------------------------------------------
def init_params(size, key):
    params = []
    for i in range(len(size) - 1):
        key, kw, kb = jax.random.split(key, 3)
        fan_in = size[i]
        bound = 1.0 / (fan_in ** 0.5)
        w = jax.random.uniform(kw, (size[i + 1], size[i]), jnp.float32, -bound, bound)
        b = jax.random.uniform(kb, (size[i + 1],), jnp.float32, -bound, bound)
        params.append((w, b))
    return params


def _reference(x, params):
    ref = x
    for i, (w, b) in enumerate(params):
        ref = ref @ w.T + b
        if i != len(params) - 1:
            ref = ref * jax.nn.sigmoid(ref)
    return ref


if __name__ == "__main__":
    size = [32, 64, 48, 16]   # Module(size=[32, 64, 48, 16])
    batch = 8

    key = jax.random.PRNGKey(0)
    kx, kp, kx2 = jax.random.split(key, 3)
    x = jax.random.normal(kx, (batch, size[0]), dtype=jnp.float32)
    params = init_params(size, kp)

    # One-time prep: transpose + lane-pad hidden dims of weights/biases.
    prepared = prepare_params(params)

    # Small-batch path (single grid step, block == full array).
    out = module_forward(x, prepared)
    out = jax.block_until_ready(out)
    ref = _reference(x, params)
    assert out.shape == (batch, size[-1])
    assert jnp.allclose(out, ref, atol=1e-5, rtol=1e-5), "Pallas output mismatch vs reference"

    # Larger batch exercising the batch grid (2 tiles of 256 rows).
    x2 = jax.random.normal(kx2, (512, size[0]), dtype=jnp.float32)
    out2 = module_forward(x2, prepared, max_batch_tile=256)
    out2 = jax.block_until_ready(out2)
    ref2 = _reference(x2, params)
    assert out2.shape == (512, size[-1])
    assert jnp.allclose(out2, ref2, atol=1e-5, rtol=1e-5), "Pallas grid-path mismatch vs reference"

    print("KERNEL_OK")
</pallas_src>

<mosaic_0001>
module attributes {stable_mosaic.version = 11 : i64} {
  func.func @kernel(%arg0: i32, %arg1: memref<8x32xf32, #tpu.memory_space<vmem>>, %arg2: memref<32x128xf32, #tpu.memory_space<vmem>>, %arg3: memref<1x128xf32, #tpu.memory_space<vmem>>, %arg4: memref<128x128xf32, #tpu.memory_space<vmem>>, %arg5: memref<1x128xf32, #tpu.memory_space<vmem>>, %arg6: memref<128x16xf32, #tpu.memory_space<vmem>>, %arg7: memref<1x16xf32, #tpu.memory_space<vmem>>, %arg8: memref<8x16xf32, #tpu.memory_space<vmem>>) attributes {dimension_semantics = [#tpu.dimension_semantics<parallel>], iteration_bounds = array<i64: 1>, scalar_prefetch = 0 : i64, scratch_operands = 0 : i64, tpu.core_type = #tpu.core_type<tc>, window_params = [{transform_indices = @transform_0, window_bounds = array<i64: 8, 32>}, {pipeline_mode = #tpu.pipeline_mode<synchronous>, transform_indices = @transform_1, window_bounds = array<i64: 32, 128>}, {pipeline_mode = #tpu.pipeline_mode<synchronous>, transform_indices = @transform_2, window_bounds = array<i64: 1, 128>}, {pipeline_mode = #tpu.pipeline_mode<synchronous>, transform_indices = @transform_3, window_bounds = array<i64: 128, 128>}, {pipeline_mode = #tpu.pipeline_mode<synchronous>, transform_indices = @transform_4, window_bounds = array<i64: 1, 128>}, {pipeline_mode = #tpu.pipeline_mode<synchronous>, transform_indices = @transform_5, window_bounds = array<i64: 128, 16>}, {pipeline_mode = #tpu.pipeline_mode<synchronous>, transform_indices = @transform_6, window_bounds = array<i64: 1, 16>}, {transform_indices = @transform_7, window_bounds = array<i64: 8, 16>}]} {
    %c0 = arith.constant 0 : index
    %c0_0 = arith.constant 0 : index
    %0 = vector.load %arg1[%c0, %c0_0] : memref<8x32xf32, #tpu.memory_space<vmem>>, vector<8x32xf32>
    %c0_1 = arith.constant 0 : index
    %c0_2 = arith.constant 0 : index
    %1 = vector.load %arg2[%c0_1, %c0_2] : memref<32x128xf32, #tpu.memory_space<vmem>>, vector<32x128xf32>
    %cst = arith.constant dense<0.000000e+00> : vector<8x128xf32>
    %2 = tpu.matmul %0, %1, %cst {dimension_numbers = #tpu.dot_dimension_numbers<[1], [0], [0], [1], [0, 0, 1, 1], [], []>} : vector<8x32xf32>, vector<32x128xf32>, vector<8x128xf32> -> vector<8x128xf32>
    %c0_3 = arith.constant 0 : index
    %c0_4 = arith.constant 0 : index
    %3 = vector.load %arg3[%c0_3, %c0_4] : memref<1x128xf32, #tpu.memory_space<vmem>>, vector<1x128xf32>
    %4 = vector.broadcast %3 : vector<1x128xf32> to vector<8x128xf32>
    %5 = arith.addf %2, %4 : vector<8x128xf32>
    %6 = arith.negf %5 : vector<8x128xf32>
    %7 = math.exp %6 : vector<8x128xf32>
    %cst_5 = arith.constant 1.000000e+00 : f32
    %8 = vector.broadcast %cst_5 : f32 to vector<8x128xf32>
    %9 = arith.addf %8, %7 : vector<8x128xf32>
    %10 = arith.divf %8, %9 : vector<8x128xf32>
    %11 = arith.mulf %5, %10 : vector<8x128xf32>
    %c0_6 = arith.constant 0 : index
    %c0_7 = arith.constant 0 : index
    %12 = vector.load %arg4[%c0_6, %c0_7] : memref<128x128xf32, #tpu.memory_space<vmem>>, vector<128x128xf32>
    %cst_8 = arith.constant dense<0.000000e+00> : vector<8x128xf32>
    %13 = tpu.matmul %11, %12, %cst_8 {dimension_numbers = #tpu.dot_dimension_numbers<[1], [0], [0], [1], [0, 0, 1, 1], [], []>} : vector<8x128xf32>, vector<128x128xf32>, vector<8x128xf32> -> vector<8x128xf32>
    %c0_9 = arith.constant 0 : index
    %c0_10 = arith.constant 0 : index
    %14 = vector.load %arg5[%c0_9, %c0_10] : memref<1x128xf32, #tpu.memory_space<vmem>>, vector<1x128xf32>
    %15 = vector.broadcast %14 : vector<1x128xf32> to vector<8x128xf32>
    %16 = arith.addf %13, %15 : vector<8x128xf32>
    %17 = arith.negf %16 : vector<8x128xf32>
    %18 = math.exp %17 : vector<8x128xf32>
    %cst_11 = arith.constant 1.000000e+00 : f32
    %19 = vector.broadcast %cst_11 : f32 to vector<8x128xf32>
    %20 = arith.addf %19, %18 : vector<8x128xf32>
    %21 = arith.divf %19, %20 : vector<8x128xf32>
    %22 = arith.mulf %16, %21 : vector<8x128xf32>
    %c0_12 = arith.constant 0 : index
    %c0_13 = arith.constant 0 : index
    %23 = vector.load %arg6[%c0_12, %c0_13] : memref<128x16xf32, #tpu.memory_space<vmem>>, vector<128x16xf32>
    %cst_14 = arith.constant dense<0.000000e+00> : vector<8x16xf32>
    %24 = tpu.matmul %22, %23, %cst_14 {dimension_numbers = #tpu.dot_dimension_numbers<[1], [0], [0], [1], [0, 0, 1, 1], [], []>} : vector<8x128xf32>, vector<128x16xf32>, vector<8x16xf32> -> vector<8x16xf32>
    %c0_15 = arith.constant 0 : index
    %c0_16 = arith.constant 0 : index
    %25 = vector.load %arg7[%c0_15, %c0_16] : memref<1x16xf32, #tpu.memory_space<vmem>>, vector<1x16xf32>
    %26 = vector.broadcast %25 : vector<1x16xf32> to vector<8x16xf32>
    %27 = arith.addf %24, %26 : vector<8x16xf32>
    %c0_17 = arith.constant 0 : index
    %c0_18 = arith.constant 0 : index
    %28 = vector.load %arg8[%c0_17, %c0_18] : memref<8x16xf32, #tpu.memory_space<vmem>>, vector<8x16xf32>
    tpu.vector_store %arg8[%c0_17, %c0_18], %27 {strides = array<i32>} : memref<8x16xf32, #tpu.memory_space<vmem>>, vector<8x16xf32>,
    return
  }
  func.func @transform_0(%arg0: i32) -> (i32, i32) {
    %c0_i32 = arith.constant 0 : i32
    %c0_i32_0 = arith.constant 0 : i32
    return %arg0, %c0_i32 : i32, i32
  }
  func.func @transform_1(%arg0: i32) -> (i32, i32) {
    %c0_i32 = arith.constant 0 : i32
    %c0_i32_0 = arith.constant 0 : i32
    %c0_i32_1 = arith.constant 0 : i32
    return %c0_i32, %c0_i32_0 : i32, i32
  }
  func.func @transform_2(%arg0: i32) -> (i32, i32) {
    %c0_i32 = arith.constant 0 : i32
    %c0_i32_0 = arith.constant 0 : i32
    %c0_i32_1 = arith.constant 0 : i32
    return %c0_i32, %c0_i32_0 : i32, i32
  }
  func.func @transform_3(%arg0: i32) -> (i32, i32) {
    %c0_i32 = arith.constant 0 : i32
    %c0_i32_0 = arith.constant 0 : i32
    %c0_i32_1 = arith.constant 0 : i32
    return %c0_i32, %c0_i32_0 : i32, i32
  }
  func.func @transform_4(%arg0: i32) -> (i32, i32) {
    %c0_i32 = arith.constant 0 : i32
    %c0_i32_0 = arith.constant 0 : i32
    %c0_i32_1 = arith.constant 0 : i32
    return %c0_i32, %c0_i32_0 : i32, i32
  }
  func.func @transform_5(%arg0: i32) -> (i32, i32) {
    %c0_i32 = arith.constant 0 : i32
    %c0_i32_0 = arith.constant 0 : i32
    %c0_i32_1 = arith.constant 0 : i32
    return %c0_i32, %c0_i32_0 : i32, i32
  }
  func.func @transform_6(%arg0: i32) -> (i32, i32) {
    %c0_i32 = arith.constant 0 : i32
    %c0_i32_0 = arith.constant 0 : i32
    %c0_i32_1 = arith.constant 0 : i32
    return %c0_i32, %c0_i32_0 : i32, i32
  }
  func.func @transform_7(%arg0: i32) -> (i32, i32) {
    %c0_i32 = arith.constant 0 : i32
    %c0_i32_0 = arith.constant 0 : i32
    return %arg0, %c0_i32 : i32, i32
  }
}

</mosaic_0001>

<bundles_post_ra>
// kernel: module_forward.1
= control target key start
LH: loop header
LB: loop body
LE: loop exit
PB: predicated region body
PF: predicated region fallthrough
CT: control target
= control target key end

     0   :  { %12 = vsyncpa [#allocation3], 0  ;;  %s730_s0 = inlined_call_operand.vmem [shape: f32[8,32], index: 0, kind: input, shape index: {}]   ;;  %s731_s1 = inlined_call_operand.hbm [shape: f32[32,128], index: 1, kind: input, shape index: {}]   ;;  %s732_s2 = inlined_call_operand.vmem [shape: f32[1,128], index: 2, kind: input, shape index: {}]   ;;  %s733_s3 = inlined_call_operand.vmem [shape: f32[128,128], index: 3, kind: input, shape index: {}]   ;;  %s734_s4 = inlined_call_operand.vmem [shape: f32[1,128], index: 4, kind: input, shape index: {}]   ;;  %s735_s5 = inlined_call_operand.vmem [shape: f32[128,16], index: 5, kind: input, shape index: {}]   ;;  %s736_s6 = inlined_call_operand.vmem [shape: f32[1,16], index: 6, kind: input, shape index: {}]   ;;  %s737_s7 = inlined_call_operand.hbm [shape: f32[8,16], index: 7, kind: output, shape index: {}]  }
   0x1   :  { %13 = vsyncpa [#allocation4], 0  ;;  %s528_s24 = smov [#allocation2]  }
   0x2   :  { %s21_s25 = sshll.u32 %s528_s24, 4  ;;  %s22_s25 = int_to_ptr.vmem [resolvable:$true] %s21_s25 }
   0x3   :  { %s492_s26 = scalar_lea.vmem %s22_s25, 512  ;;  %p497_p1 = scmp.lt.s32.totalorder %s22_s25, %s22_s25 }
   0x4   :  { %p493_p0 = scmp.ne.s32.totalorder %s22_s25, %s492_s26  ;;  %p498_p2 = scmp.lt.s32.totalorder %s492_s26, %s492_s26 }
   0x6   :  { %p499_p3 = por %p498_p2, %p497_p1 }
   0x8   :  { %p500_p4 = pnand %p499_p3, %p493_p0 }
   0xa   :  { %503 = shalt.err (!%p500_p4)
}
   0xb   :  { %s529_s27 = smov 128   ;;  %s530_s28 = smov 8  }
   0xc   :  { %27 = dma.hbm_to_vmem [thread:$0]  %s731_s1, 512, %s22_s25, [#allocation3], %s529_s27, %s529_s27, %s530_s28  }
   0xd   :  { %524 = dma.done.wait [#allocation3], 512  }
   0xe   :  { %525 = vsyncadd [#allocation3], 4294966784  ;;  %v531_v0 = vmov 0.0   ;;  %vm532_vm0 = vmmov 0   ;;  %v45_v1 = vld [vmem:[#allocation2 + $0x18] sm:$0xff]  ;;  %v44_v2 = vld [vmem:[#allocation2 + $0x10] sm:$0xff] }
   0xf   :  { %389 = vmatprep.subr.mxu0 %v531_v0  ;;  %397 = vmatprep.mubr.msk.f32.mxu0 %vm532_vm0, %v531_v0  ;;  %v43_v3 = vld [vmem:[#allocation2 + $0x8] sm:$0xff]  ;;  %v42_v4 = vld [vmem:[#allocation2] sm:$0xff]  ;;  %vm53_vm1 = vcmask 261120   ;;  %v149_v6 = vld [vmem:[%s733_s3 + $0x78] sm:$0xff]  ;;  %vm327_vm2 = vcmask 130048  }
  0x10   :  { %400 = vmatprep.subr.mxu1 %v531_v0  ;;  %432 = vmatprep.mubr.msk.f32.mxu1 %vm532_vm0, %v531_v0  ;;  %v41_v5 = vld [vmem:[%s730_s0] sm:$0xff]  ;;  %v148_v7 = vld [vmem:[%s733_s3 + $0x70] sm:$0xff]  ;;  %v147_v8 = vld [vmem:[%s733_s3 + $0x68] sm:$0xff] }
  0x11   :  { %390 = vmatpush3.msra.mxu0 %v45_v1  ;;  %401 = vmatpush3.msra.mxu1 %v149_v6  ;;  %v146_v9 = vld [vmem:[%s733_s3 + $0x60] sm:$0xff]  ;;  %v145_v10 = vld [vmem:[%s733_s3 + $0x58] sm:$0xff]  ;;  %v144_v11 = vld [vmem:[%s733_s3 + $0x50] sm:$0xff] }
  0x12   :  { %391 = vmatprep.subr.mxu0 %v531_v0  ;;  %402 = vmatprep.subr.mxu1 %v531_v0  ;;  %v143_v12 = vld [vmem:[%s733_s3 + $0x48] sm:$0xff]  ;;  %v142_v13 = vld [vmem:[%s733_s3 + $0x40] sm:$0xff]  ;;  %v141_v14 = vld [vmem:[%s733_s3 + $0x38] sm:$0xff] }
  0x13   :  { %392 = vmatpush3.msra.mxu0 %v44_v2  ;;  %403 = vmatpush3.msra.mxu1 %v148_v7  ;;  %v140_v15 = vld [vmem:[%s733_s3 + $0x30] sm:$0xff]  ;;  %v139_v16 = vld [vmem:[%s733_s3 + $0x28] sm:$0xff]  ;;  %v138_v17 = vld [vmem:[%s733_s3 + $0x20] sm:$0xff] }
  0x14   :  { %393 = vmatprep.subr.mxu0 %v531_v0  ;;  %404 = vmatprep.subr.mxu1 %v531_v0  ;;  %v137_v18 = vld [vmem:[%s733_s3 + $0x18] sm:$0xff]  ;;  %v136_v19 = vld [vmem:[%s733_s3 + $0x10] sm:$0xff]  ;;  %v135_v20 = vld [vmem:[%s733_s3 + $0x8] sm:$0xff] }
  0x15   :  { %394 = vmatpush3.msra.mxu0 %v43_v3  ;;  %405 = vmatpush3.msra.mxu1 %v147_v8  ;;  %v134_v21 = vld [vmem:[%s733_s3] sm:$0xff]  ;;  %v249_v31 = vld [vmem:[%s735_s5 + $0x78] sm:$0xff]  ;;  %v248_v32 = vld [vmem:[%s735_s5 + $0x70] sm:$0xff] }
  0x16   :  { %395 = vmatprep.subr.mxu0 %v531_v0  ;;  %406 = vmatprep.subr.mxu1 %v531_v0  ;;  %v344_v22 = vld [vmem:[%s732_s2] ss:$0 sm:$0xff]  ;;  %v247_v33 = vld [vmem:[%s735_s5 + $0x68] sm:$0xff]  ;;  %v245_v35 = vld [vmem:[%s735_s5 + $0x58] sm:$0xff] }
  0x17   :  { %396 = vmatpush3.msra.mxu0 %v42_v4  ;;  %407 = vmatpush3.msra.mxu1 %v146_v9  ;;  %v246_v34 = vld [vmem:[%s735_s5 + $0x60] sm:$0xff]  ;;  %v244_v36 = vld [vmem:[%s735_s5 + $0x50] sm:$0xff]  ;;  %v243_v37 = vld [vmem:[%s735_s5 + $0x48] sm:$0xff] }
  0x18   :  { %398 = vmatmul.mubr.msk.f32.vlgmr.msra.gmra.mxu0 %vm53_vm1, %v41_v5  ;;  %435 = vmatprep.subr.mxu0 %v531_v0  ;;  %v242_v38 = vld [vmem:[%s735_s5 + $0x40] sm:$0xff]  ;;  %v241_v39 = vld [vmem:[%s735_s5 + $0x38] sm:$0xff]  ;;  %v240_v40 = vld [vmem:[%s735_s5 + $0x30] sm:$0xff] }
  0x19   :  { %467 = vmatprep.mubr.msk.f32.mxu0 %vm532_vm0, %v531_v0  ;;  %408 = vmatprep.subr.mxu1 %v531_v0  ;;  %v239_v41 = vld [vmem:[%s735_s5 + $0x28] sm:$0xff]  ;;  %v238_v42 = vld [vmem:[%s735_s5 + $0x20] sm:$0xff]  ;;  %v237_v43 = vld [vmem:[%s735_s5 + $0x18] sm:$0xff] }
  0x1a   :  { %409 = vmatpush3.msra.mxu1 %v145_v10  ;;  %436 = vmatpush3.msra.mxu0 %v249_v31  ;;  %v236_v44 = vld [vmem:[%s735_s5 + $0x10] sm:$0xff]  ;;  %v235_v45 = vld [vmem:[%s735_s5 + $0x8] sm:$0xff]  ;;  %v234_v46 = vld [vmem:[%s735_s5] sm:$0xff]  ;;  %s533_s5 = smov [#allocation5]  }
  0x1b   :  { %410 = vmatprep.subr.mxu1 %v531_v0  ;;  %437 = vmatprep.subr.mxu0 %v531_v0  ;;  %v347_v47 = vld [vmem:[%s734_s4] ss:$0 sm:$0xff]  ;;  %s335_s24 = sshll.u32 %s533_s5, 4  ;;  %s336_s24 = int_to_ptr.vmem [resolvable:$true] %s335_s24 }
  0x1c   :  { %411 = vmatpush3.msra.mxu1 %v144_v11  ;;  %438 = vmatpush3.msra.mxu0 %v248_v32  ;;  %v349_v56 = vld [vmem:[%s736_s6] ss:$0 sm:$0xff]  ;;  %s504_s4 = scalar_lea.vmem %s336_s24, 128  ;;  %p509_p6 = scmp.lt.s32.totalorder %s336_s24, %s336_s24 }
  0x1d   :  { %412 = vmatprep.subr.mxu1 %v531_v0  ;;  %439 = vmatprep.subr.mxu0 %v531_v0  ;;  %p505_p5 = scmp.ne.s32.totalorder %s336_s24, %s504_s4  ;;  %p510_p7 = scmp.lt.s32.totalorder %s504_s4, %s504_s4 }
  0x1e   :  { %413 = vmatpush3.msra.mxu1 %v143_v12  ;;  %440 = vmatpush3.msra.mxu0 %v247_v33 }
  0x1f   :  { %414 = vmatprep.subr.mxu1 %v531_v0  ;;  %441 = vmatprep.subr.mxu0 %v531_v0  ;;  %p511_p8 = por %p510_p7, %p509_p6 }
  0x20   :  { %415 = vmatpush3.msra.mxu1 %v142_v13  ;;  %442 = vmatpush3.msra.mxu0 %v246_v34 }
  0x21   :  { %416 = vmatprep.subr.mxu1 %v531_v0  ;;  %443 = vmatprep.subr.mxu0 %v531_v0  ;;  %p512_p9 = pnand %p511_p8, %p505_p5 }
  0x22   :  { %417 = vmatpush3.msra.mxu1 %v141_v14  ;;  %444 = vmatpush3.msra.mxu0 %v245_v35 }
  0x23   :  { %418 = vmatprep.subr.mxu1 %v531_v0  ;;  %445 = vmatprep.subr.mxu0 %v531_v0 }
  0x24   :  { %419 = vmatpush3.msra.mxu1 %v140_v15  ;;  %446 = vmatpush3.msra.mxu0 %v244_v36 }
  0x25   :  { %420 = vmatprep.subr.mxu1 %v531_v0  ;;  %447 = vmatprep.subr.mxu0 %v531_v0 }
  0x26   :  { %421 = vmatpush3.msra.mxu1 %v139_v16  ;;  %448 = vmatpush3.msra.mxu0 %v243_v37 }
  0x27   :  { %422 = vmatprep.subr.mxu1 %v531_v0  ;;  %449 = vmatprep.subr.mxu0 %v531_v0 }
  0x28   :  { %423 = vmatpush3.msra.mxu1 %v138_v17  ;;  %450 = vmatpush3.msra.mxu0 %v242_v38 }
  0x29   :  { %424 = vmatprep.subr.mxu1 %v531_v0  ;;  %451 = vmatprep.subr.mxu0 %v531_v0 }
  0x2a   :  { %425 = vmatpush3.msra.mxu1 %v137_v18  ;;  %452 = vmatpush3.msra.mxu0 %v241_v39 }
  0x2b   :  { %426 = vmatprep.subr.mxu1 %v531_v0  ;;  %453 = vmatprep.subr.mxu0 %v531_v0 }
  0x2c   :  { %427 = vmatpush3.msra.mxu1 %v136_v19  ;;  %454 = vmatpush3.msra.mxu0 %v240_v40 }
  0x2d   :  { %428 = vmatprep.subr.mxu1 %v531_v0  ;;  %455 = vmatprep.subr.mxu0 %v531_v0 }
  0x2e   :  { %429 = vmatpush3.msra.mxu1 %v135_v20  ;;  %456 = vmatpush3.msra.mxu0 %v239_v41 }
  0x2f   :  { %430 = vmatprep.subr.mxu1 %v531_v0  ;;  %457 = vmatprep.subr.mxu0 %v531_v0 }
  0x30   :  { %431 = vmatpush3.msra.mxu1 %v134_v21  ;;  %458 = vmatpush3.msra.mxu0 %v238_v42 }
  0x31   :  { %459 = vmatprep.subr.mxu0 %v531_v0 }
  0x32   :  { %460 = vmatpush3.msra.mxu0 %v237_v43 }
  0x33   :  { %461 = vmatprep.subr.mxu0 %v531_v0 }
  0x34   :  { %462 = vmatpush3.msra.mxu0 %v236_v44 }
  0x35   :  { %463 = vmatprep.subr.mxu0 %v531_v0 }
  0x36   :  { %464 = vmatpush3.msra.mxu0 %v235_v45 }
  0x37   :  { %465 = vmatprep.subr.mxu0 %v531_v0 }
  0x38   :  { %466 = vmatpush3.msra.mxu0 %v234_v46 }
  0xd8   :  { %v123_v23 = vpop.f32.mrf.mxu0 }
  0xd9   :  { %v124_v24 = vadd.f32 %v344_v22, %v123_v23 }
  0xda   :  { %v399_v25 = vpop.f32.mrf.mxu0 }
  0xdb   :  { %v346_v26 = vmul.f32 -1.442695, %v124_v24 }
  0xdd   :  { %476 = vpow2.f32 %v346_v26 }
  0xea   :  { %v477_v27 = vpop.eup %476 }
  0xeb   :  { %v130_v28 = vadd.f32 1.0, %v477_v27 }
  0xed   :  { %478 = vrcp.f32 %v130_v28 }
  0xfa   :  { %v479_v29 = vpop.eup %478 }
  0xfb   :  { %v133_v30 = vmul.f32 %v479_v29, %v124_v24 }
  0xfd   :  { %433 = vmatmul.mubr.f32.vlgmr.msra.gmra.mxu1 %v133_v30 }
 0x1bd   :  { %v223_v48 = vpop.f32.mrf.mxu1 }
 0x1be   :  { %v224_v49 = vadd.f32 %v347_v47, %v223_v48 }
 0x1bf   :  { %v434_v50 = vpop.f32.mrf.mxu1 }
 0x1c0   :  { %v348_v51 = vmul.f32 -1.442695, %v224_v49 }
 0x1c2   :  { %480 = vpow2.f32 %v348_v51 }
 0x1cf   :  { %v481_v52 = vpop.eup %480 }
 0x1d0   :  { %v230_v53 = vadd.f32 1.0, %v481_v52 }
 0x1d2   :  { %482 = vrcp.f32 %v230_v53 }
 0x1df   :  { %v483_v54 = vpop.eup %482 }
 0x1e0   :  { %v233_v55 = vmul.f32 %v483_v54, %v224_v49 }
 0x1e2   :  { %468 = vmatmul.mubr.f32.vlgmr.msra.gmra.mxu0 %v233_v55 }
 0x2a2   :  { %v323_v57 = vpop.f32.mrf.mxu0 }
 0x2a3   :  { %v324_v58 = vadd.f32 %v349_v56, %v323_v57 }
 0x2a4   :  { %v469_v59 = vpop.f32.mrf.mxu0 }
 0x2a5   :  { %328 = vst.msk [vmem:[#allocation5] sm:$0xff] %vm327_vm2, %v324_v58 }
 0x2a6   :  { %515 = shalt.err (!%p512_p9)
}
 0x2a7   :  { %338 = dma.vmem_to_hbm [thread:$0]  %s336_s24, 128, %s737_s7, [#allocation4]  }
 0x2a8   :  { %526 = dma.done.wait [#allocation4], 128  }
 0x2a9   :  { %527 = vsyncadd [#allocation4], 4294967168 }
 0x2aa   :  { %342 = vsyncpa [#allocation3], 1 }
 0x2ab   :  { %343 = vsyncpa [#allocation4], 1 }

</bundles_post_ra>
